<compile_context>
chip_gen: v7x
topology: tpu7x:2x2x1
jax: 0.10.0
libtpu: 0.0.40
codegen_flags: <defaults>
</compile_context>

<pallas_src>
import math
import functools

import jax
import jax.numpy as jnp
from jax.experimental import pallas as pl
from jax.experimental.pallas import tpu as pltpu

_INV_SQRT2 = 1.0 / math.sqrt(2.0)
_WIDTHS = (4096, 2048, 1024, 512, 256, 128)


def _round_up(a: int, b: int) -> int:
    return -(-a // b) * b


def _round_down(a: int, b: int) -> int:
    return (a // b) * b


def _activate_kernel(x_ref, o_ref, *, activate_fun: str):
    x = x_ref[...]
    if activate_fun == "relu":
        # Scalar 0 avoids materializing/broadcasting a zero tile per grid step.
        o_ref[...] = jnp.maximum(x, 0)
    else:
        # Exact gelu: x * 0.5 * (1 + erf(x / sqrt(2))) -- matches torch.erf path.
        # TODO(synk): on v7x the erf polynomial makes this VALU-bound; a
        # tanh/EUP-based approximate GELU would be faster but changes the
        # module's exact-erf numerics, so we keep the exact formula.
        xf = x.astype(jnp.float32)
        y = xf * 0.5 * (1.0 + jax.lax.erf(xf * _INV_SQRT2))
        o_ref[...] = y.astype(o_ref.dtype)


def _jnp_activate(x, activation: str):
    if activation == "relu":
        return jnp.maximum(x, 0).astype(x.dtype)
    xf = x.astype(jnp.float32)
    return (xf * 0.5 * (1.0 + jax.lax.erf(xf * _INV_SQRT2))).astype(x.dtype)


def _pick_layout(n: int, itemsize: int, min_sub: int):
    """Choose (rows, width, block_rows) for a lane-dense slab.

    n must be a multiple of 128.  block_rows is either a multiple of min_sub
    (ragged last block masked by Pallas via a cdiv grid) or equal to rows.
    """
    width = 128
    for w in _WIDTHS:
        if n % w == 0:
            width = w
            break
    rows = n // width
    if rows <= min_sub:
        return rows, width, rows  # single full-array block

    bytes_per_row = width * itemsize
    # Cap each block at ~4 MiB: in+out double-buffered = 16 MiB, comfortable on
    # v5e/v6e (128 MiB VMEM) and within v7x's 64 MiB / 32 MiB scoped budget, so
    # no per-generation gating is required.
    max_rows_bytes = max(min_sub, _round_down((4 << 20) // bytes_per_row, min_sub))
    # Aim for >= 8 grid steps so the "parallel" axis can shard across v7x's two
    # TensorCores, but keep blocks >= ~512 KiB so the ~0.35us/step overhead
    # stays amortized on single-TC chips (v5e/v6e).
    split_rows = max(min_sub, _round_up(pl.cdiv(rows, 8), min_sub))
    floor_rows = max(min_sub, _round_down((512 << 10) // bytes_per_row, min_sub))
    block_rows = min(max_rows_bytes, max(split_rows, floor_rows))
    if block_rows >= rows:
        block_rows = rows
    return rows, width, block_rows


def _run_aligned(x_flat: jax.Array, activation: str) -> jax.Array:
    """Run the kernel over a flat array whose size is a multiple of 128."""
    n = x_flat.shape[0]
    dtype = x_flat.dtype
    itemsize = jnp.dtype(dtype).itemsize
    # Minimum sublane tile: 8 for 32-bit, 16 for bf16/f16, 32 for 8-bit.
    min_sub = 8 * max(1, 4 // itemsize)

    rows, width, block_rows = _pick_layout(n, itemsize, min_sub)
    x2d = x_flat.reshape(rows, width)

    kernel = functools.partial(_activate_kernel, activate_fun=activation)
    grid = (pl.cdiv(rows, block_rows),)

    out2d = pl.pallas_call(
        kernel,
        out_shape=jax.ShapeDtypeStruct((rows, width), dtype),
        grid=grid,
        in_specs=[pl.BlockSpec((block_rows, width), lambda i: (i, 0))],
        out_specs=pl.BlockSpec((block_rows, width), lambda i: (i, 0)),
        compiler_params=pltpu.CompilerParams(
            dimension_semantics=("parallel",),
            vmem_limit_bytes=32 * 1024 * 1024,
        ),
    )(x2d)
    # TODO(synk): input_output_aliases={0: 0} would halve peak HBM footprint
    # when the caller donates x; left off to keep purely functional semantics.
    return out2d.reshape(-1)


def activate_fun(x: jax.Array, activation: str = "gelu") -> jax.Array:
    """Applies relu or exact erf-gelu elementwise via a Pallas TPU kernel."""
    if activation not in ("relu", "gelu"):
        # TODO(synk): the PyTorch module silently returns None for unknown
        # activation strings; raising is clearer here.
        raise ValueError(f"unsupported activation: {activation!r}")

    orig_shape = x.shape
    n = int(x.size)
    if n == 0:
        return x

    x_flat = jnp.ravel(x)
    aligned_n = (n // 128) * 128

    if aligned_n == 0:
        # Tiny (< 128-element) input: a kernel launch is pure overhead.
        return _jnp_activate(x_flat, activation).reshape(orig_shape)

    if aligned_n == n:
        # Common case (hidden dims are multiples of 128): zero pad, zero slice.
        out_flat = _run_aligned(x_flat, activation)
    else:
        # TODO(synk): the prefix slice + concatenate still each cost one extra
        # HBM pass; a fully in-kernel ragged tail would need a masked 1-D layout.
        head = _run_aligned(x_flat[:aligned_n], activation)
        tail = _jnp_activate(x_flat[aligned_n:], activation)
        out_flat = jnp.concatenate([head, tail])

    return out_flat.reshape(orig_shape)


def _gelu_ref(x):
    xf = x.astype(jnp.float32)
    return (xf * 0.5 * (1.0 + jax.scipy.special.erf(xf * _INV_SQRT2))).astype(x.dtype)


if __name__ == "__main__":
    key = jax.random.PRNGKey(0)
    k0, k1, k2, k3, k4 = jax.random.split(key, 5)

    # Small NCHW-style input (aligned path: no pad/slice, single full block).
    x = jax.random.normal(k0, (2, 4, 16, 16), dtype=jnp.float32)
    y_gelu = jax.block_until_ready(activate_fun(x, "gelu"))
    y_relu = jax.block_until_ready(activate_fun(x, "relu"))
    assert y_gelu.shape == x.shape and y_gelu.dtype == x.dtype
    assert jnp.allclose(y_gelu, _gelu_ref(x), atol=1e-6, rtol=1e-6)
    assert jnp.allclose(y_relu, jnp.maximum(x, 0.0), atol=0.0, rtol=0.0)

    # 128-multiple but "awkward" size: still zero-copy, narrower width.
    x_odd = jax.random.normal(k1, (2, 3, 16, 16), dtype=jnp.float32)
    y_odd = jax.block_until_ready(activate_fun(x_odd, "gelu"))
    assert jnp.allclose(y_odd, _gelu_ref(x_odd), atol=1e-6, rtol=1e-6)

    # bf16 smoke test (16-sublane minimum tile path).
    x_bf16 = jax.random.normal(k2, (2, 4, 16, 16), dtype=jnp.bfloat16)
    y_bf16 = jax.block_until_ready(activate_fun(x_bf16, "gelu"))
    assert y_bf16.dtype == jnp.bfloat16
    assert jnp.allclose(y_bf16.astype(jnp.float32),
                        _gelu_ref(x_bf16).astype(jnp.float32),
                        atol=2e-2, rtol=2e-2)

    # Multi-block grid with a masked (partial) last block.
    x_big = jax.random.normal(k3, (2, 520, 128), dtype=jnp.float32)
    y_big = jax.block_until_ready(activate_fun(x_big, "gelu"))
    assert jnp.allclose(y_big, _gelu_ref(x_big), atol=1e-6, rtol=1e-6)
    y_big_r = jax.block_until_ready(activate_fun(x_big, "relu"))
    assert jnp.allclose(y_big_r, jnp.maximum(x_big, 0.0), atol=0.0, rtol=0.0)

    # Truly ragged size (n % 128 != 0): aligned prefix via kernel + jnp tail.
    x_rag = jax.random.normal(k4, (5, 7, 9), dtype=jnp.float32)
    y_rag = jax.block_until_ready(activate_fun(x_rag, "gelu"))
    assert y_rag.shape == x_rag.shape
    assert jnp.allclose(y_rag, _gelu_ref(x_rag), atol=1e-6, rtol=1e-6)

    print("KERNEL_OK")
</pallas_src>

<mosaic_0001>
module attributes {stable_mosaic.version = 11 : i64} {
  func.func @_activate_kernel(%arg0: i32, %arg1: memref<1x2048xf32, #tpu.memory_space<vmem>>, %arg2: memref<1x2048xf32, #tpu.memory_space<vmem>>) attributes {dimension_semantics = [#tpu.dimension_semantics<parallel>], iteration_bounds = array<i64: 1>, scalar_prefetch = 0 : i64, scratch_operands = 0 : i64, tpu.core_type = #tpu.core_type<tc>, window_params = [{transform_indices = @transform_0, window_bounds = array<i64: 1, 2048>}, {transform_indices = @transform_1, window_bounds = array<i64: 1, 2048>}]} {
    %c0 = arith.constant 0 : index
    %c0_0 = arith.constant 0 : index
    %0 = vector.load %arg1[%c0, %c0_0] : memref<1x2048xf32, #tpu.memory_space<vmem>>, vector<1x2048xf32>
    %cst = arith.constant 5.000000e-01 : f32
    %1 = vector.broadcast %cst : f32 to vector<1x2048xf32>
    %2 = arith.mulf %0, %1 : vector<1x2048xf32>
    %cst_1 = arith.constant 0.707106769 : f32
    %3 = vector.broadcast %cst_1 : f32 to vector<1x2048xf32>
    %4 = arith.mulf %0, %3 : vector<1x2048xf32>
    %5 = math.erf %4 : vector<1x2048xf32>
    %cst_2 = arith.constant 1.000000e+00 : f32
    %6 = vector.broadcast %cst_2 : f32 to vector<1x2048xf32>
    %7 = arith.addf %6, %5 : vector<1x2048xf32>
    %8 = arith.mulf %2, %7 : vector<1x2048xf32>
    %c0_3 = arith.constant 0 : index
    %c0_4 = arith.constant 0 : index
    %9 = vector.load %arg2[%c0_3, %c0_4] : memref<1x2048xf32, #tpu.memory_space<vmem>>, vector<1x2048xf32>
    tpu.vector_store %arg2[%c0_3, %c0_4], %8 {strides = array<i32>} : memref<1x2048xf32, #tpu.memory_space<vmem>>, vector<1x2048xf32>,
    return
  }
  func.func @transform_0(%arg0: i32) -> (i32, i32) {
    %c0_i32 = arith.constant 0 : i32
    %c0_i32_0 = arith.constant 0 : i32
    return %arg0, %c0_i32 : i32, i32
  }
  func.func @transform_1(%arg0: i32) -> (i32, i32) {
    %c0_i32 = arith.constant 0 : i32
    %c0_i32_0 = arith.constant 0 : i32
    return %arg0, %c0_i32 : i32, i32
  }
}

</mosaic_0001>

<bundles_post_ra>
// kernel: tpu_custom_call.1
= control target key start
LH: loop header
LB: loop body
LE: loop exit
PB: predicated region body
PF: predicated region fallthrough
CT: control target
= control target key end

     0   :  { %6 = vsyncpa [#allocation3], 0  ;;  %s140_s0 = inlined_call_operand.hbm [shape: f32[1,2048], index: 0, kind: input, shape index: {}]   ;;  %s141_s1 = inlined_call_operand.hbm [shape: f32[1,2048], index: 1, kind: output, shape index: {}]  }
   0x1   :  { %7 = vsyncpa [#allocation4], 0  ;;  %s104_s6 = smov [#allocation2]   ;;  %s56_s10 = scalar_lea.hbm %s140_s0, 256 }
   0x2   :  { %s14_s7 = sshll.u32 %s104_s6, 4  ;;  %p57_p0 = scmp.ne.s32.totalorder %s140_s0, %s56_s10  ;;  %s15_s7 = int_to_ptr.vmem [resolvable:$true] %s14_s7 }
   0x3   :  { %p60_p1 = scmp.lt.u32.totalorder %s56_s10, %s140_s0 }
   0x5   :  { %p62_p2 = pnand %p60_p1, %p57_p0 }
   0x7   :  { %65 = shalt.err (!%p62_p2)
}
   0x8   :  { %s66_s15 = scalar_lea.vmem %s15_s7, 256  ;;  %p71_p4 = scmp.lt.s32.totalorder %s15_s7, %s15_s7 }
   0x9   :  { %p67_p3 = scmp.ne.s32.totalorder %s15_s7, %s66_s15  ;;  %p72_p5 = scmp.lt.s32.totalorder %s66_s15, %s66_s15 }
   0xb   :  { %p73_p6 = por %p72_p5, %p71_p4 }
   0xd   :  { %p74_p7 = pnand %p73_p6, %p67_p3 }
   0xf   :  { %77 = shalt.err (!%p74_p7)
}
  0x10   :  { %17 = dma.hbm_to_vmem [thread:$0]  %s140_s0, 256, %s15_s7, [#allocation3]  }
  0x11   :  { %100 = dma.done.wait [#allocation3], 256  }
  0x12   :  { %101 = vsyncadd [#allocation3], 4294967040  ;;  %v21_v0 = vld [vmem:[#allocation2] sm:$0xff]  ;;  %v22_v1 = vld [vmem:[#allocation2 + $0x8] sm:$0xff]  ;;  %s105_s18 = smov [#allocation5]  }
  0x13   :  { %v25_v2 = vmul.f32 0.70710677, %v21_v0  ;;  %v26_v3 = vmul.f32 0.70710677, %v22_v1  ;;  %v23_v4 = vmul.f32 0.5, %v21_v0  ;;  %v24_v6 = vmul.f32 0.5, %v22_v1 }
  0x14   :  { %s41_s19 = sshll.u32 %s105_s18, 4  ;;  %s42_s19 = int_to_ptr.vmem [resolvable:$true] %s41_s19 }
  0x15   :  { %52 = verf.f32 %v25_v2  ;;  %s78_s0 = scalar_lea.vmem %s42_s19, 256  ;;  %p83_p9 = scmp.lt.s32.totalorder %s42_s19, %s42_s19 }
  0x16   :  { %54 = verf.f32 %v26_v3  ;;  %p79_p8 = scmp.ne.s32.totalorder %s42_s19, %s78_s0  ;;  %p84_p10 = scmp.lt.s32.totalorder %s78_s0, %s78_s0 }
  0x18   :  { %p85_p11 = por %p84_p10, %p83_p9 }
  0x1a   :  { %p86_p12 = pnand %p85_p11, %p79_p8 }
  0x1f   :  { %v53_v5 = vpop.eup %52 }
  0x20   :  { %v55_v7 = vpop.eup %54  ;;  %v29_v8 = vadd.f32 1.0, %v53_v5 }
  0x21   :  { %v30_v9 = vadd.f32 1.0, %v55_v7 }
  0x22   :  { %v31_v10 = vmul.f32 %v29_v8, %v23_v4 }
  0x23   :  { %v32_v11 = vmul.f32 %v30_v9, %v24_v6 }
  0x24   :  { %33 = vst [vmem:[#allocation5] sm:$0xff] %v31_v10 }
  0x25   :  { %34 = vst [vmem:[#allocation5 + $0x8] sm:$0xff] %v32_v11 }
  0x26   :  { %89 = shalt.err (!%p86_p12)
}
  0x27   :  { %s90_s22 = scalar_lea.hbm %s141_s1, 256 }
  0x28   :  { %p91_p13 = scmp.ne.s32.totalorder %s141_s1, %s90_s22  ;;  %p94_p0 = scmp.lt.u32.totalorder %s90_s22, %s141_s1 }
  0x2a   :  { %p96_p1 = pnand %p94_p0, %p91_p13 }
  0x2c   :  { %99 = shalt.err (!%p96_p1)
}
  0x2d   :  { %44 = dma.vmem_to_hbm [thread:$0]  %s42_s19, 256, %s141_s1, [#allocation4]  }
  0x2e   :  { %102 = dma.done.wait [#allocation4], 256  }
  0x2f   :  { %103 = vsyncadd [#allocation4], 4294967040 }
  0x30   :  { %48 = vsyncpa [#allocation3], 1 }
  0x31   :  { %49 = vsyncpa [#allocation4], 1 }

</bundles_post_ra>
